<compile_context>
chip_gen: v7x
topology: tpu7x:2x2x1
jax: 0.10.0
libtpu: 0.0.40
codegen_flags: <defaults>
</compile_context>

<pallas_src>
import functools

import jax
import jax.numpy as jnp
from jax.experimental import pallas as pl
from jax.experimental.pallas import tpu as pltpu


def _round_up(x: int, m: int) -> int:
    return (x + m - 1) // m * m


def _cdiv(a: int, b: int) -> int:
    return (a + b - 1) // b


def _make_actor_kernel(num_hidden_layers: int, output_dim: int):
    """Fused MLP: num_hidden_layers tanh layers + final linear, store real lanes."""

    def kernel(x_ref, *refs):
        # refs = [w0, b0, ..., w_{H-1}, b_{H-1}, w_last, b_last, out_ref]
        h = x_ref[...]
        idx = 0
        for _ in range(num_hidden_layers):
            w = refs[idx][...]      # (in, out_pad) -- pre-transposed, lane-dense
            b = refs[idx + 1][...]  # (1, out_pad)
            idx += 2
            h = jnp.tanh(
                jnp.dot(h, w, preferred_element_type=jnp.float32,
                        precision=jax.lax.Precision.HIGHEST) + b)
        w_last = refs[idx][...]      # (hidden_pad, out_pad)
        b_last = refs[idx + 1][...]  # (1, out_pad)
        out_ref = refs[idx + 2]      # (bt, output_dim) -- un-padded HBM writeback
        mu = jnp.dot(h, w_last, preferred_element_type=jnp.float32,
                     precision=jax.lax.Precision.HIGHEST) + b_last
        # mu is lane-padded in VMEM for the MXU; only real columns hit HBM.
        out_ref[...] = mu[:, :output_dim].astype(out_ref.dtype)

    return kernel


def init_actor_params(key, layer_num, input_dim, output_dim, hidden_dim):
    """Orthogonal weights (stored pre-transposed as (in, out)), zero biases.

    Mirrors Network.network_init semantics (orthogonal weights, zero bias).
    """
    layers_unit = [input_dim] + [hidden_dim] * (layer_num - 1)
    ortho = jax.nn.initializers.orthogonal()
    keys = jax.random.split(key, len(layers_unit))
    params = []
    for idx in range(len(layers_unit) - 1):
        w = ortho(keys[idx], (layers_unit[idx], layers_unit[idx + 1]), jnp.float32)
        b = jnp.zeros((1, layers_unit[idx + 1]), jnp.float32)
        params += [w, b]
    w_last = ortho(keys[-1], (layers_unit[-1], output_dim), jnp.float32)
    b_last = jnp.zeros((1, output_dim), jnp.float32)
    params += [w_last, b_last]
    return params


def prepare_kernel_params(params_flat, *, lane=128):
    """One-time lane-padding of weights/biases (exact: zero pads contribute 0).

    Hidden widths and the last layer's output columns are padded to a multiple
    of `lane`; the input width (rows of the first weight) is left alone so x
    never needs padding.
    """
    num_hidden = len(params_flat) // 2 - 1
    padded = []
    for i in range(num_hidden + 1):
        w, b = params_flat[2 * i], params_flat[2 * i + 1]
        in_d, out_d = w.shape
        in_pad = in_d if i == 0 else _round_up(in_d, lane)
        out_pad = _round_up(out_d, lane)
        padded.append(jnp.pad(w, ((0, in_pad - in_d), (0, out_pad - out_d))))
        padded.append(jnp.pad(b, ((0, 0), (0, out_pad - out_d))))
    return padded


def _choose_batch_tile(batch: int, batch_tile: int) -> int:
    if batch <= 8:
        return batch  # single full block; block dim == array dim is legal
    # Big tiles amortize the ~0.35us/step grid overhead, but cap at ~half the
    # batch so there are always >= 2 grid steps for v7x's two TensorCores.
    half = _round_up(_cdiv(batch, 2), 8)
    return max(8, min(batch_tile, half))


@functools.partial(jax.jit, static_argnames=("output_dim", "batch_tile"))
def actor_forward(x, kernel_params, output_dim, batch_tile=2048):
    # kernel_params = [w0, b0, ..., w_last, b_last], weights (in, out), padded.
    kernel_params = list(kernel_params)
    num_hidden = len(kernel_params) // 2 - 1
    batch, input_dim = x.shape

    bt = _choose_batch_tile(batch, batch_tile)
    grid = (_cdiv(batch, bt),)  # partial edge block allowed; no x padding

    # x streams over the batch grid; weights/biases use a constant index_map so
    # they stay VMEM-resident across grid steps.
    in_specs = [pl.BlockSpec((bt, input_dim), lambda i: (i, 0))]
    for p in kernel_params:
        in_specs.append(pl.BlockSpec(p.shape, lambda i: (0, 0)))
    out_spec = pl.BlockSpec((bt, output_dim), lambda i: (i, 0))

    # Advisory cost estimate for XLA's scheduler.
    flops = 0
    for li in range(num_hidden + 1):
        w = kernel_params[2 * li]
        flops += 2 * batch * int(w.shape[0]) * int(w.shape[1])
    transcendentals = batch * sum(
        int(kernel_params[2 * li].shape[1]) for li in range(num_hidden))
    param_bytes = sum(int(p.size) * p.dtype.itemsize for p in kernel_params)
    bytes_accessed = 4 * batch * (input_dim + output_dim) + param_bytes

    mu = pl.pallas_call(
        _make_actor_kernel(num_hidden, output_dim),
        grid=grid,
        out_shape=jax.ShapeDtypeStruct((batch, output_dim), jnp.float32),
        in_specs=in_specs,
        out_specs=out_spec,
        compiler_params=pltpu.CompilerParams(
            dimension_semantics=("parallel",),
        ),
        cost_estimate=pl.CostEstimate(
            flops=flops,
            transcendentals=transcendentals,
            bytes_accessed=bytes_accessed,
        ),
    )(x, *kernel_params)

    # trainable_std == False path: std = exp(zeros_like(mu)) == 1.0 exactly.
    std = jnp.ones_like(mu)
    return mu, std


def actor_forward_ref(x, params_flat):
    """Pure-JAX reference matching the PyTorch Actor.forward semantics."""
    num_hidden = len(params_flat) // 2 - 1
    h = x
    for i in range(num_hidden):
        w, b = params_flat[2 * i], params_flat[2 * i + 1]
        h = jnp.tanh(jnp.dot(h, w, precision=jax.lax.Precision.HIGHEST) + b)
    mu = jnp.dot(h, params_flat[-2],
                 precision=jax.lax.Precision.HIGHEST) + params_flat[-1]
    std = jnp.exp(jnp.zeros_like(mu))
    return mu, std


if __name__ == "__main__":
    # Actor(layer_num=3, input_dim=16, output_dim=8, hidden_dim=32)
    layer_num, input_dim, output_dim, hidden_dim = 3, 16, 8, 32

    key = jax.random.PRNGKey(0)
    k_x, k_x2, k_p = jax.random.split(key, 3)

    params = init_actor_params(k_p, layer_num, input_dim, output_dim, hidden_dim)
    kparams = prepare_kernel_params(params)   # one-time padding, outside jit

    # Small rollout-style batch (single grid step, block == full batch).
    x = jax.random.normal(k_x, (8, input_dim), jnp.float32)
    mu, std = actor_forward(x, kparams, output_dim)
    mu = jax.block_until_ready(mu)
    std = jax.block_until_ready(std)
    mu_ref, std_ref = actor_forward_ref(x, params)
    assert mu.shape == (8, output_dim) and std.shape == (8, output_dim)
    assert jnp.allclose(mu, mu_ref, atol=1e-5, rtol=1e-5)
    assert jnp.allclose(std, std_ref)

    # Larger batch exercising >=2 grid steps and a partial edge block.
    x2 = jax.random.normal(k_x2, (200, input_dim), jnp.float32)
    mu2, std2 = actor_forward(x2, kparams, output_dim)
    mu2 = jax.block_until_ready(mu2)
    mu2_ref, _ = actor_forward_ref(x2, params)
    assert mu2.shape == (200, output_dim)
    assert jnp.allclose(mu2, mu2_ref, atol=1e-5, rtol=1e-5)

    print("KERNEL_OK")
</pallas_src>

<mosaic_0001>
module attributes {stable_mosaic.version = 11 : i64} {
  func.func @kernel(%arg0: i32, %arg1: memref<8x16xf32, #tpu.memory_space<vmem>>, %arg2: memref<16x128xf32, #tpu.memory_space<vmem>>, %arg3: memref<1x128xf32, #tpu.memory_space<vmem>>, %arg4: memref<128x128xf32, #tpu.memory_space<vmem>>, %arg5: memref<1x128xf32, #tpu.memory_space<vmem>>, %arg6: memref<128x128xf32, #tpu.memory_space<vmem>>, %arg7: memref<1x128xf32, #tpu.memory_space<vmem>>, %arg8: memref<8x8xf32, #tpu.memory_space<vmem>>) attributes {dimension_semantics = [#tpu.dimension_semantics<parallel>], iteration_bounds = array<i64: 1>, scalar_prefetch = 0 : i64, scratch_operands = 0 : i64, tpu.core_type = #tpu.core_type<tc>, window_params = [{transform_indices = @transform_0, window_bounds = array<i64: 8, 16>}, {pipeline_mode = #tpu.pipeline_mode<synchronous>, transform_indices = @transform_1, window_bounds = array<i64: 16, 128>}, {pipeline_mode = #tpu.pipeline_mode<synchronous>, transform_indices = @transform_2, window_bounds = array<i64: 1, 128>}, {pipeline_mode = #tpu.pipeline_mode<synchronous>, transform_indices = @transform_3, window_bounds = array<i64: 128, 128>}, {pipeline_mode = #tpu.pipeline_mode<synchronous>, transform_indices = @transform_4, window_bounds = array<i64: 1, 128>}, {pipeline_mode = #tpu.pipeline_mode<synchronous>, transform_indices = @transform_5, window_bounds = array<i64: 128, 128>}, {pipeline_mode = #tpu.pipeline_mode<synchronous>, transform_indices = @transform_6, window_bounds = array<i64: 1, 128>}, {transform_indices = @transform_7, window_bounds = array<i64: 8, 8>}]} {
    %c0 = arith.constant 0 : index
    %c0_0 = arith.constant 0 : index
    %0 = vector.load %arg1[%c0, %c0_0] : memref<8x16xf32, #tpu.memory_space<vmem>>, vector<8x16xf32>
    %c0_1 = arith.constant 0 : index
    %c0_2 = arith.constant 0 : index
    %1 = vector.load %arg2[%c0_1, %c0_2] : memref<16x128xf32, #tpu.memory_space<vmem>>, vector<16x128xf32>
    %c0_3 = arith.constant 0 : index
    %c0_4 = arith.constant 0 : index
    %2 = vector.load %arg3[%c0_3, %c0_4] : memref<1x128xf32, #tpu.memory_space<vmem>>, vector<1x128xf32>
    %cst = arith.constant dense<0.000000e+00> : vector<8x128xf32>
    %3 = tpu.matmul %0, %1, %cst {dimension_numbers = #tpu.dot_dimension_numbers<[1], [0], [0], [1], [0, 0, 1, 1], [], []>, precision = #tpu.contract_precision<fp32>} : vector<8x16xf32>, vector<16x128xf32>, vector<8x128xf32> -> vector<8x128xf32>
    %4 = vector.broadcast %2 : vector<1x128xf32> to vector<8x128xf32>
    %5 = arith.addf %3, %4 : vector<8x128xf32>
    %6 = math.tanh %5 : vector<8x128xf32>
    %c0_5 = arith.constant 0 : index
    %c0_6 = arith.constant 0 : index
    %7 = vector.load %arg4[%c0_5, %c0_6] : memref<128x128xf32, #tpu.memory_space<vmem>>, vector<128x128xf32>
    %c0_7 = arith.constant 0 : index
    %c0_8 = arith.constant 0 : index
    %8 = vector.load %arg5[%c0_7, %c0_8] : memref<1x128xf32, #tpu.memory_space<vmem>>, vector<1x128xf32>
    %cst_9 = arith.constant dense<0.000000e+00> : vector<8x128xf32>
    %9 = tpu.matmul %6, %7, %cst_9 {dimension_numbers = #tpu.dot_dimension_numbers<[1], [0], [0], [1], [0, 0, 1, 1], [], []>, precision = #tpu.contract_precision<fp32>} : vector<8x128xf32>, vector<128x128xf32>, vector<8x128xf32> -> vector<8x128xf32>
    %10 = vector.broadcast %8 : vector<1x128xf32> to vector<8x128xf32>
    %11 = arith.addf %9, %10 : vector<8x128xf32>
    %12 = math.tanh %11 : vector<8x128xf32>
    %c0_10 = arith.constant 0 : index
    %c0_11 = arith.constant 0 : index
    %13 = vector.load %arg6[%c0_10, %c0_11] : memref<128x128xf32, #tpu.memory_space<vmem>>, vector<128x128xf32>
    %c0_12 = arith.constant 0 : index
    %c0_13 = arith.constant 0 : index
    %14 = vector.load %arg7[%c0_12, %c0_13] : memref<1x128xf32, #tpu.memory_space<vmem>>, vector<1x128xf32>
    %cst_14 = arith.constant dense<0.000000e+00> : vector<8x128xf32>
    %15 = tpu.matmul %12, %13, %cst_14 {dimension_numbers = #tpu.dot_dimension_numbers<[1], [0], [0], [1], [0, 0, 1, 1], [], []>, precision = #tpu.contract_precision<fp32>} : vector<8x128xf32>, vector<128x128xf32>, vector<8x128xf32> -> vector<8x128xf32>
    %16 = vector.broadcast %14 : vector<1x128xf32> to vector<8x128xf32>
    %17 = arith.addf %15, %16 : vector<8x128xf32>
    %18 = vector.extract_strided_slice %17 {offsets = [0, 0], sizes = [8, 8], strides = [1, 1]} : vector<8x128xf32> to vector<8x8xf32>
    %c0_15 = arith.constant 0 : index
    %c0_16 = arith.constant 0 : index
    %19 = vector.load %arg8[%c0_15, %c0_16] : memref<8x8xf32, #tpu.memory_space<vmem>>, vector<8x8xf32>
    tpu.vector_store %arg8[%c0_15, %c0_16], %18 {strides = array<i32>} : memref<8x8xf32, #tpu.memory_space<vmem>>, vector<8x8xf32>,
    return
  }
  func.func @transform_0(%arg0: i32) -> (i32, i32) {
    %c0_i32 = arith.constant 0 : i32
    %c0_i32_0 = arith.constant 0 : i32
    return %arg0, %c0_i32 : i32, i32
  }
  func.func @transform_1(%arg0: i32) -> (i32, i32) {
    %c0_i32 = arith.constant 0 : i32
    %c0_i32_0 = arith.constant 0 : i32
    %c0_i32_1 = arith.constant 0 : i32
    return %c0_i32, %c0_i32_0 : i32, i32
  }
  func.func @transform_2(%arg0: i32) -> (i32, i32) {
    %c0_i32 = arith.constant 0 : i32
    %c0_i32_0 = arith.constant 0 : i32
    %c0_i32_1 = arith.constant 0 : i32
    return %c0_i32, %c0_i32_0 : i32, i32
  }
  func.func @transform_3(%arg0: i32) -> (i32, i32) {
    %c0_i32 = arith.constant 0 : i32
    %c0_i32_0 = arith.constant 0 : i32
    %c0_i32_1 = arith.constant 0 : i32
    return %c0_i32, %c0_i32_0 : i32, i32
  }
  func.func @transform_4(%arg0: i32) -> (i32, i32) {
    %c0_i32 = arith.constant 0 : i32
    %c0_i32_0 = arith.constant 0 : i32
    %c0_i32_1 = arith.constant 0 : i32
    return %c0_i32, %c0_i32_0 : i32, i32
  }
  func.func @transform_5(%arg0: i32) -> (i32, i32) {
    %c0_i32 = arith.constant 0 : i32
    %c0_i32_0 = arith.constant 0 : i32
    %c0_i32_1 = arith.constant 0 : i32
    return %c0_i32, %c0_i32_0 : i32, i32
  }
  func.func @transform_6(%arg0: i32) -> (i32, i32) {
    %c0_i32 = arith.constant 0 : i32
    %c0_i32_0 = arith.constant 0 : i32
    %c0_i32_1 = arith.constant 0 : i32
    return %c0_i32, %c0_i32_0 : i32, i32
  }
  func.func @transform_7(%arg0: i32) -> (i32, i32) {
    %c0_i32 = arith.constant 0 : i32
    %c0_i32_0 = arith.constant 0 : i32
    return %arg0, %c0_i32 : i32, i32
  }
}

</mosaic_0001>

<bundles_post_ra>
// kernel: actor_forward.1
= control target key start
LH: loop header
LB: loop body
LE: loop exit
PB: predicated region body
PF: predicated region fallthrough
CT: control target
= control target key end

     0   :  { %12 = vsyncpa [#allocation3], 0  ;;  %s3738_s0 = inlined_call_operand.hbm [shape: f32[8,16], index: 0, kind: input, shape index: {}]   ;;  %s3739_s1 = inlined_call_operand.hbm [shape: f32[16,128], index: 1, kind: input, shape index: {}]   ;;  %s3740_s2 = inlined_call_operand.vmem [shape: f32[1,128], index: 2, kind: input, shape index: {}]   ;;  %s3741_s3 = inlined_call_operand.hbm [shape: f32[128,128], index: 3, kind: input, shape index: {}]   ;;  %s3742_s4 = inlined_call_operand.vmem [shape: f32[1,128], index: 4, kind: input, shape index: {}]   ;;  %s3743_s5 = inlined_call_operand.hbm [shape: f32[128,128], index: 5, kind: input, shape index: {}]   ;;  %s3744_s6 = inlined_call_operand.vmem [shape: f32[1,128], index: 6, kind: input, shape index: {}]   ;;  %s3745_s7 = inlined_call_operand.hbm [shape: f32[8,8], index: 7, kind: output, shape index: {}]  }
   0x1   :  { %13 = vsyncpa [#allocation6], 0 }
   0x2   :  { %14 = vsyncpa [#allocation9], 0 }
   0x3   :  { %15 = vsyncpa [#allocation4], 0  ;;  %s3059_s24 = smov [#allocation5]   ;;  %s2941_s28 = scalar_lea.hbm %s3739_s1, 256 }
   0x4   :  { %s31_s25 = sshll.u32 %s3059_s24, 4  ;;  %p2942_p0 = scmp.ne.s32.totalorder %s3739_s1, %s2941_s28  ;;  %s32_s25 = int_to_ptr.vmem [resolvable:$true] %s31_s25 }
   0x5   :  { %p2945_p1 = scmp.lt.u32.totalorder %s2941_s28, %s3739_s1 }
   0x7   :  { %p2947_p2 = pnand %p2945_p1, %p2942_p0 }
   0x9   :  { %2950 = shalt.err (!%p2947_p2)
}
   0xa   :  { %s2951_s10 = scalar_lea.vmem %s32_s25, 256  ;;  %p2956_p4 = scmp.lt.s32.totalorder %s32_s25, %s32_s25 }
   0xb   :  { %p2952_p3 = scmp.ne.s32.totalorder %s32_s25, %s2951_s10  ;;  %p2957_p5 = scmp.lt.s32.totalorder %s2951_s10, %s2951_s10 }
   0xd   :  { %p2958_p6 = por %p2957_p5, %p2956_p4 }
   0xf   :  { %p2959_p7 = pnand %p2958_p6, %p2952_p3 }
  0x11   :  { %2962 = shalt.err (!%p2959_p7)
}
  0x12   :  { %s3060_s11 = smov 128   ;;  %s3061_s12 = smov 8  }
  0x13   :  { %37 = dma.hbm_to_vmem [thread:$0]  %s3739_s1, 256, %s32_s25, [#allocation6], %s3060_s11, %s3060_s11, %s3061_s12  }
  0x14   :  { %s3062_s15 = smov [#allocation2]   ;;  %s3063_s17 = smov [#allocation7]  }
  0x15   :  { %s22_s16 = sshll.u32 %s3062_s15, 4  ;;  %s45_s18 = sshll.u32 %s3063_s17, 4  ;;  %s23_s16 = int_to_ptr.vmem [resolvable:$true] %s22_s16  ;;  %s46_s18 = int_to_ptr.vmem [resolvable:$true] %s45_s18 }
  0x16   :  { %s2963_s21 = scalar_lea.hbm %s3738_s0, 128 }
  0x17   :  { %p2964_p8 = scmp.ne.s32.totalorder %s3738_s0, %s2963_s21  ;;  %p2967_p9 = scmp.lt.u32.totalorder %s2963_s21, %s3738_s0 }
  0x19   :  { %p2969_p10 = pnand %p2967_p9, %p2964_p8 }
  0x1b   :  { %2972 = shalt.err (!%p2969_p10)
}
  0x1c   :  { %s2973_s1 = scalar_lea.vmem %s23_s16, 128  ;;  %p2978_p12 = scmp.lt.s32.totalorder %s23_s16, %s23_s16 }
  0x1d   :  { %p2974_p11 = scmp.ne.s32.totalorder %s23_s16, %s2973_s1  ;;  %p2979_p13 = scmp.lt.s32.totalorder %s2973_s1, %s2973_s1 }
  0x1f   :  { %p2980_p0 = por %p2979_p13, %p2978_p12 }
  0x21   :  { %p2981_p1 = pnand %p2980_p0, %p2974_p11 }
  0x23   :  { %2984 = shalt.err (!%p2981_p1)
}
  0x24   :  { %25 = dma.hbm_to_vmem [thread:$0]  %s3738_s0, 128, %s23_s16, [#allocation3]  }
  0x25   :  { %s2985_s30 = scalar_lea.hbm %s3741_s3, 2048 }
  0x26   :  { %p2986_p2 = scmp.ne.s32.totalorder %s3741_s3, %s2985_s30  ;;  %p2989_p3 = scmp.lt.u32.totalorder %s2985_s30, %s3741_s3 }
  0x28   :  { %p2991_p4 = pnand %p2989_p3, %p2986_p2 }
  0x2a   :  { %2994 = shalt.err (!%p2991_p4)
}
  0x2b   :  { %s2995_s14 = scalar_lea.vmem %s46_s18, 2048  ;;  %p3000_p6 = scmp.lt.s32.totalorder %s46_s18, %s46_s18 }
  0x2c   :  { %p2996_p5 = scmp.ne.s32.totalorder %s46_s18, %s2995_s14  ;;  %p3001_p7 = scmp.lt.s32.totalorder %s2995_s14, %s2995_s14 }
  0x2e   :  { %p3002_p8 = por %p3001_p7, %p3000_p6 }
  0x30   :  { %p3003_p9 = pnand %p3002_p8, %p2996_p5 }
  0x32   :  { %3006 = shalt.err (!%p3003_p9)
}
  0x33   :  { %51 = dma.hbm_to_vmem [thread:$0]  %s3741_s3, 2048, %s46_s18, [#allocation6], %s3060_s11, %s3060_s11, %s3061_s12  }
  0x34   :  { %s3064_s16 = smov [#allocation8]   ;;  %s3007_s21 = scalar_lea.hbm %s3743_s5, 2048 }
  0x35   :  { %s59_s17 = sshll.u32 %s3064_s16, 4  ;;  %p3008_p10 = scmp.ne.s32.totalorder %s3743_s5, %s3007_s21  ;;  %s60_s17 = int_to_ptr.vmem [resolvable:$true] %s59_s17 }
  0x36   :  { %p3011_p11 = scmp.lt.u32.totalorder %s3007_s21, %s3743_s5 }
  0x38   :  { %p3013_p12 = pnand %p3011_p11, %p3008_p10 }
  0x3a   :  { %3016 = shalt.err (!%p3013_p12)
}
  0x3b   :  { %s3017_s1 = scalar_lea.vmem %s60_s17, 2048  ;;  %p3022_p0 = scmp.lt.s32.totalorder %s60_s17, %s60_s17 }
  0x3c   :  { %p3018_p13 = scmp.ne.s32.totalorder %s60_s17, %s3017_s1  ;;  %p3023_p1 = scmp.lt.s32.totalorder %s3017_s1, %s3017_s1 }
  0x3e   :  { %p3024_p2 = por %p3023_p1, %p3022_p0 }
  0x40   :  { %p3025_p3 = pnand %p3024_p2, %p3018_p13 }
  0x42   :  { %3028 = shalt.err (!%p3025_p3)
}
  0x43   :  { %65 = dma.hbm_to_vmem [thread:$0]  %s3743_s5, 2048, %s60_s17, [#allocation9], %s3060_s11, %s3060_s11, %s3061_s12  }
  0x44   :  { %3051 = dma.done.wait [#allocation3], 128  }
  0x45   :  { %3052 = vsyncadd [#allocation3], 4294967168 }
  0x46   :  { %3053 = dma.done.wait [#allocation6], 2304  }
  0x47   :  { %3054 = vsyncadd [#allocation6], 4294964992 }
  0x48   :  { %3055 = dma.done.wait [#allocation9], 2048  }
  0x49   :  { %3056 = vsyncadd [#allocation9], 4294965248  ;;  %v3065_v0 = vmov 0.0|0.0   ;;  %vm3066_vm0 = vmmov 0   ;;  %v3067_v1 = vmov 0.0   ;;  %vm90_vm1 = vcmask 130048  }
  0x4a   :  { %2598 = vmatprep.subr.bf16.mxu0 %v3065_v0  ;;  %2152 = vmatprep.mubr.msk.f32.mxu0 %vm3066_vm0, %v3067_v1  ;;  %v81_v2 = vld [vmem:[#allocation5] sm:$0xff]  ;;  %v82_v3 = vld [vmem:[#allocation5 + $0x8] sm:$0xff]  ;;  %v80_v4 = vld [vmem:[#allocation2] sm:$0xff]  ;;  %s3068_s27 = smov [#allocation10]   ;;  %vm1883_vm2 = vcmask 64512  }
  0x4b   :  { %2589 = vmatprep.subr.bf16.mxu1 %v3065_v0  ;;  %2131 = vmatprep.mubr.msk.f32.mxu1 %vm3066_vm0, %v3067_v1  ;;  %v95_v5 = vand.u32 4294901760, %v81_v2  ;;  %v98_v6 = vand.u32 4294901760, %v82_v3  ;;  %v92_v7 = vsel %vm90_vm1, %v80_v4, 0  ;;  %v554_v8 = vld [vmem:[#allocation7] sm:$0xff]  ;;  %v555_v9 = vld [vmem:[#allocation7 + $0x8] sm:$0xff]  ;;  %v556_v32 = vld [vmem:[#allocation7 + $0x10] sm:$0xff] }
  0x4c   :  { %v161_v10 = vand.u32 4294901760, %v92_v7  ;;  %v578_v11 = vand.u32 4294901760, %v554_v8  ;;  %v581_v12 = vand.u32 4294901760, %v555_v9  ;;  %v557_v33 = vld [vmem:[#allocation7 + $0x18] sm:$0xff]  ;;  %v584_v34 = vand.u32 4294901760, %v556_v32  ;;  %v558_v39 = vld [vmem:[#allocation7 + $0x20] sm:$0xff] }
  0x4d   :  { %v2590_v13 = vpack.c.bf16 %v98_v6, %v95_v5  ;;  %v173_v14 = vsub.f32 %v81_v2, %v95_v5  ;;  %v180_v15 = vsub.f32 %v82_v3, %v98_v6  ;;  %v587_v35 = vand.u32 4294901760, %v557_v33  ;;  %v559_v40 = vld [vmem:[#allocation7 + $0x28] sm:$0xff]  ;;  %v560_v44 = vld [vmem:[#allocation7 + $0x30] sm:$0xff]  ;;  %v561_v45 = vld [vmem:[#allocation7 + $0x38] sm:$0xff]  ;;  %s1891_s28 = sshll.u32 %s3068_s27, 4  ;;  %s1892_s28 = int_to_ptr.vmem [resolvable:$true] %s1891_s28 }
  0x4e   :  { %v162_v16 = vsub.f32 %v92_v7, %v161_v10  ;;  %v3172_v17 = vsub.f32 %v554_v8, %v578_v11  ;;  %v3174_v18 = vsub.f32 %v555_v9, %v581_v12  ;;  %v3190_v31 = vpack.c.bf16 %v581_v12, %v578_v11  ;;  %v562_v49 = vld [vmem:[#allocation7 + $0x40] sm:$0xff]  ;;  %v563_v50 = vld [vmem:[#allocation7 + $0x48] sm:$0xff]  ;;  %v564_v54 = vld [vmem:[#allocation7 + $0x50] sm:$0xff]  ;;  %s3029_s29 = scalar_lea.vmem %s1892_s28, 128  ;;  %p3034_p5 = scmp.lt.s32.totalorder %s1892_s28, %s1892_s28 }
  0x4f   :  { %2600 = vmatpush3.bf16.msra.mxu0 %v2590_v13  ;;  %2591 = vmatpush3.bf16.msra.mxu1 %v2590_v13  ;;  %v174_v19 = vand.u32 4294901760, %v173_v14  ;;  %v181_v20 = vand.u32 4294901760, %v180_v15  ;;  %v2596_v30 = vpack.c.bf16 %v180_v15, %v173_v14  ;;  %v3198_v36 = vpack.c.bf16 %v587_v35, %v584_v34  ;;  %v565_v55 = vld [vmem:[#allocation7 + $0x58] sm:$0xff]  ;;  %v566_v59 = vld [vmem:[#allocation7 + $0x60] sm:$0xff]  ;;  %v567_v60 = vld [vmem:[#allocation7 + $0x68] sm:$0xff]  ;;  %p3030_p4 = scmp.ne.s32.totalorder %s1892_s28, %s3029_s29  ;;  %p3035_p6 = scmp.lt.s32.totalorder %s3029_s29, %s3029_s29 }
  0x50   :  { %v163_v21 = vand.u32 4294901760, %v162_v16  ;;  %2592 = vmatprep.subr.bf16.mxu1 %v3065_v0  ;;  %2601 = vmatprep.subr.bf16.mxu0 %v3065_v0  ;;  %v3200_v37 = vsub.f32 %v556_v32, %v584_v34  ;;  %v3202_v38 = vsub.f32 %v557_v33, %v587_v35  ;;  %v590_v41 = vand.u32 4294901760, %v558_v39  ;;  %v568_v5 = vld [vmem:[#allocation7 + $0x70] sm:$0xff]  ;;  %v569_v6 = vld [vmem:[#allocation7 + $0x78] sm:$0xff] }
  0x51   :  { %v175_v22 = vsub.f32 %v173_v14, %v174_v19  ;;  %v182_v23 = vsub.f32 %v180_v15, %v181_v20  ;;  %v2602_v24 = vpack.c.bf16 %v181_v20, %v174_v19  ;;  %v593_v42 = vand.u32 4294901760, %v559_v40  ;;  %p3036_p7 = por %p3035_p6, %p3034_p5 }
  0x52   :  { %2153 = vmatmul.mubr.f32.vlgmr.msra.gmra.mrb[0].mxu0 %v163_v21  ;;  %v164_v25 = vsub.f32 %v162_v16, %v163_v21  ;;  %v596_v46 = vand.u32 4294901760, %v560_v44  ;;  %v599_v47 = vand.u32 4294901760, %v561_v45  ;;  %v602_v51 = vand.u32 4294901760, %v562_v49 }
  0x53   :  { %v176_v26 = vand.u32 4294901760, %v175_v22  ;;  %v183_v27 = vand.u32 4294901760, %v182_v23  ;;  %2603 = vmatpush3.bf16.msra.mxu0 %v2602_v24  ;;  %2159 = vmatprep.mubr.msk.f32.mxu0 %vm3066_vm0, %v3067_v1  ;;  %v3206_v43 = vpack.c.bf16 %v593_v42, %v590_v41  ;;  %v605_v52 = vand.u32 4294901760, %v563_v50  ;;  %p3037_p8 = pnand %p3036_p7, %p3030_p4 }
  0x54   :  { %v165_v28 = vand.u32 4294901760, %v164_v25  ;;  %2604 = vmatprep.subr.bf16.mxu0 %v3065_v0  ;;  %v3210_v48 = vpack.c.bf16 %v599_v47, %v596_v46  ;;  %v608_v56 = vand.u32 4294901760, %v564_v54  ;;  %v611_v57 = vand.u32 4294901760, %v565_v55 }
  0x55   :  { %v2593_v29 = vpack.c.bf16 %v183_v27, %v176_v26  ;;  %v3214_v53 = vpack.c.bf16 %v605_v52, %v602_v51  ;;  %v614_v61 = vand.u32 4294901760, %v566_v59  ;;  %v617_v62 = vand.u32 4294901760, %v567_v60 }
  0x56   :  { %2132 = vmatmul.mubr.f32.vlgmr.msra.gmra.mrb[0].mxu1 %v165_v28  ;;  %v3218_v58 = vpack.c.bf16 %v611_v57, %v608_v56  ;;  %v3222_v63 = vsub.f32 %v558_v39, %v590_v41  ;;  %v3224_v2 = vsub.f32 %v559_v40, %v593_v42  ;;  %v3226_v3 = vsub.f32 %v560_v44, %v596_v46 }
  0x57   :  { %2594 = vmatpush3.bf16.msra.mxu1 %v2593_v29  ;;  %2138 = vmatprep.mubr.msk.f32.mxu1 %vm3066_vm0, %v3067_v1  ;;  %v3228_v4 = vsub.f32 %v561_v45, %v599_v47  ;;  %v3230_v7 = vsub.f32 %v562_v49, %v602_v51  ;;  %v3232_v8 = vsub.f32 %v563_v50, %v605_v52  ;;  %v620_v14 = vand.u32 4294901760, %v568_v5 }
  0x58   :  { %2595 = vmatprep.subr.bf16.mxu1 %v3065_v0  ;;  %v3234_v9 = vsub.f32 %v564_v54, %v608_v56  ;;  %v3238_v11 = vpack.c.bf16 %v617_v62, %v614_v61  ;;  %v3240_v12 = vsub.f32 %v566_v59, %v614_v61  ;;  %v623_v15 = vand.u32 4294901760, %v569_v6 }
  0x59   :  { %v678_v19 = vand.u32 4294901760, %v3174_v18  ;;  %v3247_v20 = vsub.f32 %v568_v5, %v620_v14  ;;  %v685_v27 = vand.u32 4294901760, %v3200_v37  ;;  %v692_v28 = vand.u32 4294901760, %v3202_v38 }
  0x5a   :  { %2160 = vmatmul.mubr.f32.vlgmr.msra.gmra.mrb[0].mxu0 %v161_v10  ;;  %v3250_v21 = vpack.c.bf16 %v623_v15, %v620_v14  ;;  %v3252_v22 = vsub.f32 %v569_v6, %v623_v15  ;;  %v699_v35 = vand.u32 4294901760, %v3222_v63  ;;  %v706_v39 = vand.u32 4294901760, %v3224_v2 }
  0x5b   :  { %2606 = vmatpush3.bf16.msra.mxu0 %v2590_v13  ;;  %2166 = vmatprep.mubr.msk.f32.mxu0 %vm3066_vm0, %v3067_v1  ;;  %v3242_v13 = vsub.f32 %v567_v60, %v617_v62  ;;  %v679_v24 = vsub.f32 %v3174_v18, %v678_v19  ;;  %v693_v32 = vsub.f32 %v3202_v38, %v692_v28  ;;  %v713_v46 = vand.u32 4294901760, %v3226_v3 }
  0x5c   :  { %2751 = vmatprep.subr.bf16.mxu0 %v3065_v0  ;;  %v700_v41 = vsub.f32 %v3222_v63, %v699_v35  ;;  %v707_v42 = vsub.f32 %v3224_v2, %v706_v39  ;;  %v720_v47 = vand.u32 4294901760, %v3228_v4  ;;  %v734_v56 = vand.u32 4294901760, %v3232_v8 }
  0x5d   :  { %v680_v26 = vand.u32 4294901760, %v679_v24  ;;  %v694_v34 = vand.u32 4294901760, %v693_v32  ;;  %v714_v50 = vsub.f32 %v3226_v3, %v713_v46  ;;  %v3751_v5 = vand.u32 4294901760, %v3234_v9 }
  0x5e   :  { %2139 = vmatmul.mubr.f32.vlgmr.msra.gmra.mrb[0].mxu1 %v161_v10  ;;  %v701_v44 = vand.u32 4294901760, %v700_v41  ;;  %v708_v45 = vand.u32 4294901760, %v707_v42  ;;  %v721_v51 = vsub.f32 %v3228_v4, %v720_v47  ;;  %v735_v60 = vsub.f32 %v3232_v8, %v734_v56 }
  0x5f   :  { %2597 = vmatpush3.bf16.msra.mxu1 %v2596_v30  ;;  %2145 = vmatprep.mubr.msk.f32.mxu1 %vm3066_vm0, %v3067_v1  ;;  %v686_v30 = vsub.f32 %v3200_v37, %v685_v27  ;;  %v715_v52 = vand.u32 4294901760, %v714_v50  ;;  %v742_v15 = vsub.f32 %v3234_v9, %v3751_v5 }
  0x60   :  { %2607 = vmatprep.subr.bf16.mxu1 %v3065_v0  ;;  %v2638_v49 = vpack.c.bf16 %v708_v45, %v701_v44  ;;  %v722_v54 = vand.u32 4294901760, %v721_v51  ;;  %v736_v62 = vand.u32 4294901760, %v735_v60  ;;  %v3747_v44 = vand.u32 4294901760, %v3247_v20 }
  0x61   :  { %v687_v33 = vand.u32 4294901760, %v686_v30  ;;  %v743_v24 = vand.u32 4294901760, %v742_v15  ;;  %v3748_v30 = vand.u32 4294901760, %v3242_v13  ;;  %v3746_v45 = vand.u32 4294901760, %v3252_v22 }
  0x62   :  { %2167 = vmatmul.mubr.f32.vlgmr.msra.gmra.mrb[0].mxu0 %v161_v10  ;;  %v3236_v10 = vsub.f32 %v565_v55, %v611_v57  ;;  %v727_v55 = vand.u32 4294901760, %v3230_v7  ;;  %v2641_v57 = vpack.c.bf16 %v722_v54, %v715_v52  ;;  %v770_v51 = vsub.f32 %v3247_v20, %v3747_v44 }
  0x63   :  { %2411 = vmatprep.mubr.msk.f32.mxu0 %vm3066_vm0, %v3067_v1  ;;  %v3274_v40 = vpack.c.bf16 %v694_v34, %v687_v33  ;;  %v763_v34 = vsub.f32 %v3242_v13, %v3748_v30  ;;  %v777_v52 = vsub.f32 %v3252_v22, %v3746_v45  ;;  %v2662_v15 = vpack.c.bf16 %v3224_v2, %v3222_v63 }
  0x64   :  { %v728_v59 = vsub.f32 %v3230_v7, %v727_v55  ;;  %v3750_v6 = vand.u32 4294901760, %v3236_v10  ;;  %v771_v54 = vand.u32 4294901760, %v770_v51  ;;  %v1902_v51 = vld [vmem:[%s3740_s2] ss:$0 sm:$0xff]  ;;  %v3757_v63 = vand.u32 4294901760, %v3236_v10 }
  0x65   :  { %v764_v42 = vand.u32 4294901760, %v763_v34  ;;  %v2677_v34 = vpack.c.bf16 %v3252_v22, %v3247_v20 }
  0x66   :  { %2146 = vmatmul.mubr.f32.vlgmr.msra.gmra.mrb[0].mxu1 %v162_v16  ;;  %v671_v16 = vand.u32 4294901760, %v3172_v17  ;;  %v729_v61 = vand.u32 4294901760, %v728_v59  ;;  %v778_v59 = vand.u32 4294901760, %v777_v52 }
  0x67   :  { %2609 = vmatpush3.bf16.msra.mxu1 %v3190_v31  ;;  %2201 = vmatprep.mubr.msk.f32.mxu1 %vm3066_vm0, %v3067_v1 }
  0x68   :  { %2610 = vmatprep.subr.bf16.mxu1 %v3065_v0  ;;  %v672_v23 = vsub.f32 %v3172_v17, %v671_v16  ;;  %v2644_v14 = vpack.c.bf16 %v736_v62, %v729_v61  ;;  %v2653_v60 = vpack.c.bf16 %v778_v59, %v771_v54  ;;  %v2656_v61 = vpack.c.bf16 %v3174_v18, %v3172_v17 }
  0x69   :  { %v2659_v62 = vpack.c.bf16 %v3202_v38, %v3200_v37  ;;  %v2710_v17 = vpack.c.bf16 %v706_v39, %v699_v35  ;;  %v2713_v18 = vpack.c.bf16 %v720_v47, %v713_v46  ;;  %v2716_v37 = vpack.c.bf16 %v734_v56, %v727_v55  ;;  %v1230_v35 = vld [vmem:[#allocation8 + $0x58] sm:$0xff]  ;;  %v1231_v55 = vld [vmem:[#allocation8 + $0x60] sm:$0xff]  ;;  %v1232_v56 = vld [vmem:[#allocation8 + $0x68] sm:$0xff] }
  0x6a   :  { %v673_v25 = vand.u32 4294901760, %v672_v23  ;;  %v749_v23 = vsub.f32 %v3236_v10, %v3750_v6  ;;  %v3756_v38 = vand.u32 4294901760, %v3234_v9  ;;  %v1276_v46 = vand.u32 4294901760, %v1230_v35 }
  0x6b   :  { %2612 = vmatpush3.bf16.msra.mxu1 %v3198_v36 }
  0x6c   :  { %2613 = vmatprep.subr.bf16.mxu1 %v3065_v0  ;;  %v3264_v29 = vpack.c.bf16 %v680_v26, %v673_v25  ;;  %v750_v25 = vand.u32 4294901760, %v749_v23  ;;  %v3749_v26 = vand.u32 4294901760, %v3240_v12  ;;  %v2665_v23 = vpack.c.bf16 %v3228_v4, %v3226_v3 }
  0x6d   :  { %v2719_v2 = vpack.c.bf16 %v3757_v63, %v3756_v38  ;;  %v3758_v3 = vand.u32 4294901760, %v3240_v12  ;;  %v3759_v4 = vand.u32 4294901760, %v3242_v13 }
  0x6e   :  { %v2647_v32 = vpack.c.bf16 %v750_v25, %v743_v24  ;;  %v756_v33 = vsub.f32 %v3240_v12, %v3749_v26  ;;  %v2668_v24 = vpack.c.bf16 %v3232_v8, %v3230_v7  ;;  %v2671_v25 = vpack.c.bf16 %v3236_v10, %v3234_v9  ;;  %v1226_v10 = vld [vmem:[#allocation8 + $0x38] sm:$0xff] }
  0x6f   :  { %2615 = vmatpush3.bf16.msra.mxu1 %v3206_v43  ;;  %v3760_v7 = vand.u32 4294901760, %v3247_v20  ;;  %v3761_v8 = vand.u32 4294901760, %v3252_v22  ;;  %v1228_v20 = vld [vmem:[#allocation8 + $0x48] sm:$0xff] }
  0x70   :  { %2616 = vmatprep.subr.bf16.mxu1 %v3065_v0  ;;  %v757_v41 = vand.u32 4294901760, %v756_v33  ;;  %v2674_v33 = vpack.c.bf16 %v3242_v13, %v3240_v12  ;;  %v1264_v12 = vand.u32 4294901760, %v1226_v10  ;;  %v1227_v13 = vld [vmem:[#allocation8 + $0x40] sm:$0xff]  ;;  %v1270_v22 = vand.u32 4294901760, %v1228_v20 }
  0x72   :  { %v2650_v50 = vpack.c.bf16 %v764_v42, %v757_v41 }
  0x73   :  { %2618 = vmatpush3.bf16.msra.mxu1 %v3210_v48 }
  0x74   :  { %2619 = vmatprep.subr.bf16.mxu1 %v3065_v0 }
  0x77   :  { %2621 = vmatpush3.bf16.msra.mxu1 %v3214_v53 }
  0x78   :  { %2622 = vmatprep.subr.bf16.mxu1 %v3065_v0 }
  0x7b   :  { %2624 = vmatpush3.bf16.msra.mxu1 %v3218_v58 }
  0x7c   :  { %2625 = vmatprep.subr.bf16.mxu1 %v3065_v0 }
  0x7f   :  { %2627 = vmatpush3.bf16.msra.mxu1 %v3238_v11 }
  0x80   :  { %2628 = vmatprep.subr.bf16.mxu1 %v3065_v0 }
  0x83   :  { %2630 = vmatpush3.bf16.msra.mxu1 %v3250_v21 }
  0x84   :  { %2631 = vmatprep.subr.bf16.mxu1 %v3065_v0 }
 0x135   :  { %v549_v41 = vpop.f32.mrb[0].mxu0 }
 0x136   :  { %v2168_v42 = vpop.f32.mrb[1].mxu0 }
 0x139   :  { %v324_v52 = vpop.f32.mrb[0].mxu1 }
 0x13a   :  { %v2895_v54 = vadd.f32 %v1902_v51, %v324_v52  ;;  %v2147_v59 = vpop.f32.mrb[1].mxu1  ;;  %v3507_v52 = vsub.f32 %v1226_v10, %v1264_v12 }
 0x13b   :  { %v3512_v59 = vsub.f32 %v1228_v20, %v1270_v22 }
 0x13c   :  { %v2896_v45 = vadd.f32 %v2895_v54, %v549_v41 }
 0x13e   :  { %2937 = vtanh.f32 %v2896_v45 }
 0x148   :  { %v2938_v44 = vpop.eup %2937 }
 0x149   :  { %v3341_v30 = vand.u32 4294901760, %v2938_v44 }
 0x14b   :  { %v3344_v26 = vsub.f32 %v2938_v44, %v3341_v30 }
 0x14d   :  { %v660_v6 = vand.u32 4294901760, %v3344_v26 }
 0x14f   :  { %v661_v42 = vsub.f32 %v3344_v26, %v660_v6 }
 0x151   :  { %v662_v5 = vand.u32 4294901760, %v661_v42 }
 0x153   :  { %2202 = vmatmul.mubr.f32.vlgmr.msra.gmra.mrb[2].mxu1 %v662_v5 }
 0x154   :  { %2633 = vmatpush3.bf16.msra.mxu1 %v3264_v29  ;;  %2236 = vmatprep.mubr.msk.f32.mxu1 %vm3066_vm0, %v3067_v1  ;;  %v1219_v29 = vld [vmem:[#allocation8] sm:$0xff] }
 0x155   :  { %2634 = vmatprep.subr.bf16.mxu1 %v3065_v0 }
 0x158   :  { %2636 = vmatpush3.bf16.msra.mxu1 %v3274_v40  ;;  %v1220_v40 = vld [vmem:[#allocation8 + $0x8] sm:$0xff] }
 0x159   :  { %2637 = vmatprep.subr.bf16.mxu1 %v3065_v0  ;;  %v1246_v5 = vand.u32 4294901760, %v1220_v40 }
 0x15c   :  { %2639 = vmatpush3.bf16.msra.mxu1 %v2638_v49  ;;  %v1221_v49 = vld [vmem:[#allocation8 + $0x10] sm:$0xff] }
 0x15d   :  { %2640 = vmatprep.subr.bf16.mxu1 %v3065_v0 }
 0x160   :  { %2642 = vmatpush3.bf16.msra.mxu1 %v2641_v57  ;;  %v1243_v57 = vand.u32 4294901760, %v1219_v29 }
 0x161   :  { %2643 = vmatprep.subr.bf16.mxu1 %v3065_v0 }
 0x162   :  { %v3366_v45 = vpack.c.bf16 %v1246_v5, %v1243_v57 }
 0x164   :  { %2645 = vmatpush3.bf16.msra.mxu1 %v2644_v14  ;;  %v1222_v14 = vld [vmem:[#allocation8 + $0x18] sm:$0xff]  ;;  %2753 = vmatpush3.bf16.msra.mxu0 %v3366_v45 }
 0x165   :  { %2646 = vmatprep.subr.bf16.mxu1 %v3065_v0  ;;  %v1252_v44 = vand.u32 4294901760, %v1222_v14  ;;  %2754 = vmatprep.subr.bf16.mxu0 %v3065_v0 }
 0x167   :  { %v3374_v51 = vsub.f32 %v1222_v14, %v1252_v44 }
 0x168   :  { %2648 = vmatpush3.bf16.msra.mxu1 %v2647_v32  ;;  %v1249_v32 = vand.u32 4294901760, %v1221_v49 }
 0x169   :  { %2649 = vmatprep.subr.bf16.mxu1 %v3065_v0  ;;  %v1357_v38 = vand.u32 4294901760, %v3374_v51 }
 0x16a   :  { %v3372_v41 = vsub.f32 %v1221_v49, %v1249_v32 }
 0x16c   :  { %2651 = vmatpush3.bf16.msra.mxu1 %v2650_v50  ;;  %v3368_v50 = vsub.f32 %v1219_v29, %v1243_v57  ;;  %v3516_v29 = vsub.f32 %v1230_v35, %v1276_v46 }
 0x16d   :  { %2652 = vmatprep.subr.bf16.mxu1 %v3065_v0 }
 0x16e   :  { %v1336_v14 = vand.u32 4294901760, %v3368_v50 }
 0x170   :  { %2654 = vmatpush3.bf16.msra.mxu1 %v2653_v60  ;;  %v3370_v60 = vsub.f32 %v1220_v40, %v1246_v5 }
 0x171   :  { %2655 = vmatprep.subr.bf16.mxu1 %v3065_v0 }
 0x173   :  { %2237 = vmatmul.mubr.f32.vlgmr.msra.gmra.mrb[2].mxu1 %v3341_v30 }
 0x174   :  { %2657 = vmatpush3.bf16.msra.mxu1 %v2656_v61  ;;  %2271 = vmatprep.mubr.msk.f32.mxu1 %vm3066_vm0, %v3067_v1  ;;  %v3377_v61 = vpack.c.bf16 %v1252_v44, %v1249_v32  ;;  %v1343_v32 = vand.u32 4294901760, %v3370_v60 }
 0x175   :  { %2658 = vmatprep.subr.bf16.mxu1 %v3065_v0 }
 0x176   :  { %2756 = vmatpush3.bf16.msra.mxu0 %v3377_v61 }
 0x177   :  { %2757 = vmatprep.subr.bf16.mxu0 %v3065_v0 }
 0x178   :  { %2660 = vmatpush3.bf16.msra.mxu1 %v2659_v62  ;;  %v2704_v62 = vpack.c.bf16 %v678_v19, %v671_v16  ;;  %v2722_v16 = vpack.c.bf16 %v3759_v4, %v3758_v3  ;;  %v2725_v19 = vpack.c.bf16 %v3761_v8, %v3760_v7  ;;  %v1358_v4 = vsub.f32 %v3374_v51, %v1357_v38 }
 0x179   :  { %2661 = vmatprep.subr.bf16.mxu1 %v3065_v0 }
 0x17a   :  { %v1359_v8 = vand.u32 4294901760, %v1358_v4 }
 0x17c   :  { %2663 = vmatpush3.bf16.msra.mxu1 %v2662_v15  ;;  %v2707_v15 = vpack.c.bf16 %v692_v28, %v685_v27  ;;  %v1229_v28 = vld [vmem:[#allocation8 + $0x50] sm:$0xff] }
 0x17d   :  { %2664 = vmatprep.subr.bf16.mxu1 %v3065_v0  ;;  %v1273_v39 = vand.u32 4294901760, %v1229_v28 }
 0x17f   :  { %v3495_v47 = vpack.c.bf16 %v1276_v46, %v1273_v39  ;;  %v3514_v42 = vsub.f32 %v1229_v28, %v1273_v39  ;;  %v1399_v39 = vand.u32 4294901760, %v3512_v59 }
 0x180   :  { %2666 = vmatpush3.bf16.msra.mxu1 %v2665_v23  ;;  %v1233_v23 = vld [vmem:[#allocation8 + $0x70] sm:$0xff] }
 0x181   :  { %2667 = vmatprep.subr.bf16.mxu1 %v3065_v0  ;;  %v1285_v57 = vand.u32 4294901760, %v1233_v23 }
 0x184   :  { %2669 = vmatpush3.bf16.msra.mxu1 %v2668_v24  ;;  %v1234_v24 = vld [vmem:[#allocation8 + $0x78] sm:$0xff] }
 0x185   :  { %2670 = vmatprep.subr.bf16.mxu1 %v3065_v0  ;;  %v1288_v5 = vand.u32 4294901760, %v1234_v24 }
 0x187   :  { %v3525_v44 = vpack.c.bf16 %v1288_v5, %v1285_v57 }
 0x188   :  { %2672 = vmatpush3.bf16.msra.mxu1 %v2671_v25 }
 0x189   :  { %2673 = vmatprep.subr.bf16.mxu1 %v3065_v0 }
 0x18c   :  { %2675 = vmatpush3.bf16.msra.mxu1 %v2674_v33 }
 0x18d   :  { %2676 = vmatprep.subr.bf16.mxu1 %v3065_v0 }
 0x190   :  { %2678 = vmatpush3.bf16.msra.mxu1 %v2677_v34 }
 0x191   :  { %2679 = vmatprep.subr.bf16.mxu1 %v3065_v0 }
 0x193   :  { %2272 = vmatmul.mubr.f32.vlgmr.msra.gmra.mrb[2].mxu1 %v3344_v26  ;;  %v1282_v26 = vand.u32 4294901760, %v1232_v56 }
 0x194   :  { %2681 = vmatpush3.bf16.msra.mxu1 %v3190_v31  ;;  %2306 = vmatprep.mubr.msk.f32.mxu1 %vm3066_vm0, %v3067_v1 }
 0x195   :  { %2682 = vmatprep.subr.bf16.mxu1 %v3065_v0  ;;  %v3521_v49 = vsub.f32 %v1232_v56, %v1282_v26  ;;  %v1400_v56 = vsub.f32 %v3512_v59, %v1399_v39 }
 0x198   :  { %2684 = vmatpush3.bf16.msra.mxu1 %v3198_v36 }
 0x199   :  { %2685 = vmatprep.subr.bf16.mxu1 %v3065_v0 }
 0x19c   :  { %2687 = vmatpush3.bf16.msra.mxu1 %v3206_v43 }
 0x19d   :  { %2688 = vmatprep.subr.bf16.mxu1 %v3065_v0 }
 0x1a0   :  { %2690 = vmatpush3.bf16.msra.mxu1 %v3210_v48 }
 0x1a1   :  { %2691 = vmatprep.subr.bf16.mxu1 %v3065_v0 }
 0x1a4   :  { %2693 = vmatpush3.bf16.msra.mxu1 %v3214_v53 }
 0x1a5   :  { %2694 = vmatprep.subr.bf16.mxu1 %v3065_v0 }
 0x1a8   :  { %2696 = vmatpush3.bf16.msra.mxu1 %v3218_v58 }
 0x1a9   :  { %2697 = vmatprep.subr.bf16.mxu1 %v3065_v0 }
 0x1ac   :  { %2699 = vmatpush3.bf16.msra.mxu1 %v3238_v11 }
 0x1ad   :  { %2700 = vmatprep.subr.bf16.mxu1 %v3065_v0 }
 0x1b0   :  { %2702 = vmatpush3.bf16.msra.mxu1 %v3250_v21 }
 0x1b1   :  { %2703 = vmatprep.subr.bf16.mxu1 %v3065_v0 }
 0x1b3   :  { %2307 = vmatmul.mubr.f32.vlgmr.msra.gmra.mrb[2].mxu1 %v660_v6  ;;  %v1279_v6 = vand.u32 4294901760, %v1231_v55 }
 0x1b4   :  { %2705 = vmatpush3.bf16.msra.mxu1 %v2704_v62  ;;  %2341 = vmatprep.mubr.msk.f32.mxu1 %vm3066_vm0, %v3067_v1  ;;  %v3527_v62 = vsub.f32 %v1233_v23, %v1285_v57  ;;  %v1406_v23 = vand.u32 4294901760, %v3514_v42 }
 0x1b5   :  { %2706 = vmatprep.subr.bf16.mxu1 %v3065_v0  ;;  %v3519_v40 = vsub.f32 %v1231_v55, %v1279_v6 }
 0x1b8   :  { %2708 = vmatpush3.bf16.msra.mxu1 %v2707_v15  ;;  %v3529_v15 = vsub.f32 %v1234_v24, %v1288_v5  ;;  %v1413_v24 = vand.u32 4294901760, %v3516_v29  ;;  %v1407_v5 = vsub.f32 %v3514_v42, %v1406_v23 }
 0x1b9   :  { %2709 = vmatprep.subr.bf16.mxu1 %v3065_v0 }
 0x1bc   :  { %2711 = vmatpush3.bf16.msra.mxu1 %v2710_v17  ;;  %v1337_v17 = vsub.f32 %v3368_v50, %v1336_v14 }
 0x1bd   :  { %2712 = vmatprep.subr.bf16.mxu1 %v3065_v0 }
 0x1be   :  { %v1338_v63 = vand.u32 4294901760, %v1337_v17  ;;  %v1414_v17 = vsub.f32 %v3516_v29, %v1413_v24 }
 0x1c0   :  { %2714 = vmatpush3.bf16.msra.mxu1 %v2713_v18  ;;  %v1344_v18 = vsub.f32 %v3370_v60, %v1343_v32 }
 0x1c1   :  { %2715 = vmatprep.subr.bf16.mxu1 %v3065_v0 }
 0x1c4   :  { %2717 = vmatpush3.bf16.msra.mxu1 %v2716_v37  ;;  %v1350_v37 = vand.u32 4294901760, %v3372_v41 }
 0x1c5   :  { %2718 = vmatprep.subr.bf16.mxu1 %v3065_v0 }
 0x1c6   :  { %v1351_v3 = vsub.f32 %v3372_v41, %v1350_v37 }
 0x1c8   :  { %2720 = vmatpush3.bf16.msra.mxu1 %v2719_v2  ;;  %v1345_v2 = vand.u32 4294901760, %v1344_v18  ;;  %v1352_v7 = vand.u32 4294901760, %v1351_v3  ;;  %v1408_v18 = vand.u32 4294901760, %v1407_v5  ;;  %v3754_v3 = vand.u32 4294901760, %v3521_v49 }
 0x1c9   :  { %2721 = vmatprep.subr.bf16.mxu1 %v3065_v0 }
 0x1cc   :  { %2723 = vmatpush3.bf16.msra.mxu1 %v2722_v16  ;;  %v3547_v16 = vpack.c.bf16 %v1345_v2, %v1338_v63  ;;  %v1415_v63 = vand.u32 4294901760, %v1414_v17  ;;  %v3755_v2 = vand.u32 4294901760, %v3519_v40 }
 0x1cd   :  { %2724 = vmatprep.subr.bf16.mxu1 %v3065_v0 }
 0x1ce   :  { %v2791_v4 = vpack.c.bf16 %v1415_v63, %v1408_v18  ;;  %v2815_v63 = vpack.c.bf16 %v3516_v29, %v3514_v42 }
 0x1d0   :  { %2726 = vmatpush3.bf16.msra.mxu1 %v2725_v19 }
 0x1d1   :  { %2727 = vmatprep.subr.bf16.mxu1 %v3065_v0 }
 0x1d3   :  { %2342 = vmatmul.mubr.f32.vlgmr.msra.gmra.mrb[2].mxu1 %v3341_v30 }
 0x1d4   :  { %2729 = vmatpush3.bf16.msra.mxu1 %v3190_v31  ;;  %2376 = vmatprep.mubr.msk.f32.mxu1 %vm3066_vm0, %v3067_v1  ;;  %v1223_v31 = vld [vmem:[#allocation8 + $0x20] sm:$0xff] }
 0x1d5   :  { %2730 = vmatprep.subr.bf16.mxu1 %v3065_v0 }
 0x1d8   :  { %2732 = vmatpush3.bf16.msra.mxu1 %v3198_v36  ;;  %v1224_v36 = vld [vmem:[#allocation8 + $0x28] sm:$0xff] }
 0x1d9   :  { %2733 = vmatprep.subr.bf16.mxu1 %v3065_v0 }
 0x1dc   :  { %2735 = vmatpush3.bf16.msra.mxu1 %v3206_v43  ;;  %v1255_v43 = vand.u32 4294901760, %v1223_v31 }
 0x1dd   :  { %2736 = vmatprep.subr.bf16.mxu1 %v3065_v0 }
 0x1de   :  { %v3501_v25 = vsub.f32 %v1223_v31, %v1255_v43 }
 0x1e0   :  { %2738 = vmatpush3.bf16.msra.mxu1 %v3210_v48  ;;  %v1258_v48 = vand.u32 4294901760, %v1224_v36  ;;  %v1364_v19 = vand.u32 4294901760, %v3501_v25 }
 0x1e1   :  { %2739 = vmatprep.subr.bf16.mxu1 %v3065_v0 }
 0x1e2   :  { %v3483_v9 = vpack.c.bf16 %v1258_v48, %v1255_v43  ;;  %v3503_v33 = vsub.f32 %v1224_v36, %v1258_v48  ;;  %v3551_v36 = vpack.c.bf16 %v1359_v8, %v1352_v7  ;;  %v1365_v43 = vsub.f32 %v3501_v25, %v1364_v19 }
 0x1e3   :  { %v1421_v7 = vsub.f32 %v3519_v40, %v3755_v2  ;;  %v1428_v8 = vsub.f32 %v3521_v49, %v3754_v3 }
 0x1e4   :  { %2741 = vmatpush3.bf16.msra.mxu1 %v3214_v53  ;;  %v1225_v53 = vld [vmem:[#allocation8 + $0x30] sm:$0xff]  ;;  %2759 = vmatpush3.bf16.msra.mxu0 %v3483_v9  ;;  %v1371_v31 = vand.u32 4294901760, %v3503_v33  ;;  %v2806_v5 = vpack.c.bf16 %v3503_v33, %v3501_v25  ;;  %v3762_v25 = vand.u32 4294901760, %v3519_v40 }
 0x1e5   :  { %2742 = vmatprep.subr.bf16.mxu1 %v3065_v0  ;;  %2760 = vmatprep.subr.bf16.mxu0 %v3065_v0 }
 0x1e6   :  { %v1372_v48 = vsub.f32 %v3503_v33, %v1371_v31  ;;  %v3763_v33 = vand.u32 4294901760, %v3521_v49 }
 0x1e8   :  { %2744 = vmatpush3.bf16.msra.mxu1 %v3218_v58  ;;  %v1261_v58 = vand.u32 4294901760, %v1225_v53 }
 0x1e9   :  { %2745 = vmatprep.subr.bf16.mxu1 %v3065_v0 }
 0x1ea   :  { %v3505_v34 = vsub.f32 %v1225_v53, %v1261_v58  ;;  %v1366_v53 = vand.u32 4294901760, %v1365_v43  ;;  %v1422_v43 = vand.u32 4294901760, %v1421_v7  ;;  %v2818_v7 = vpack.c.bf16 %v3521_v49, %v3519_v40 }
 0x1ec   :  { %2747 = vmatpush3.bf16.msra.mxu1 %v3238_v11  ;;  %v3487_v11 = vpack.c.bf16 %v1264_v12, %v1261_v58  ;;  %v1378_v10 = vand.u32 4294901760, %v3505_v34  ;;  %v1385_v58 = vand.u32 4294901760, %v3507_v52  ;;  %v1373_v12 = vand.u32 4294901760, %v1372_v48 }
 0x1ed   :  { %2748 = vmatprep.subr.bf16.mxu1 %v3065_v0  ;;  %v1429_v48 = vand.u32 4294901760, %v1428_v8  ;;  %v2809_v17 = vpack.c.bf16 %v3507_v52, %v3505_v34  ;;  %v2821_v8 = vpack.c.bf16 %v3529_v15, %v3527_v62 }
 0x1ee   :  { %2762 = vmatpush3.bf16.msra.mxu0 %v3487_v11  ;;  %v1386_v20 = vsub.f32 %v3507_v52, %v1385_v58  ;;  %v3764_v52 = vand.u32 4294901760, %v3527_v62 }
 0x1ef   :  { %2763 = vmatprep.subr.bf16.mxu0 %v3065_v0 }
 0x1f0   :  { %2750 = vmatpush3.bf16.msra.mxu1 %v3250_v21  ;;  %v1267_v21 = vand.u32 4294901760, %v1227_v13  ;;  %v1387_v28 = vand.u32 4294901760, %v1386_v20 }
 0x1f2   :  { %v3491_v27 = vpack.c.bf16 %v1270_v22, %v1267_v21  ;;  %v3510_v54 = vsub.f32 %v1227_v13, %v1267_v21  ;;  %v1379_v13 = vsub.f32 %v3505_v34, %v1378_v10  ;;  %v2782_v21 = vpack.c.bf16 %v1373_v12, %v1366_v53 }
 0x1f3   :  { %2377 = vmatmul.mubr.f32.vlgmr.msra.gmra.mrb[2].mxu1 %v3341_v30  ;;  %v3499_v30 = vpack.c.bf16 %v1282_v26, %v1279_v6  ;;  %v1401_v26 = vand.u32 4294901760, %v1400_v56  ;;  %v3753_v53 = vand.u32 4294901760, %v3527_v62  ;;  %v3752_v12 = vand.u32 4294901760, %v3529_v15 }
 0x1f4   :  { %2765 = vmatpush3.bf16.msra.mxu0 %v3491_v27  ;;  %v1380_v22 = vand.u32 4294901760, %v1379_v13  ;;  %v1392_v35 = vand.u32 4294901760, %v3510_v54  ;;  %v2794_v13 = vpack.c.bf16 %v1429_v48, %v1422_v43  ;;  %v2812_v18 = vpack.c.bf16 %v3512_v59, %v3510_v54  ;;  %v1903_v43 = vld [vmem:[%s3742_s4] ss:$0 sm:$0xff] }
 0x1f5   :  { %2766 = vmatprep.subr.bf16.mxu0 %v3065_v0  ;;  %v1435_v20 = vsub.f32 %v3527_v62, %v3753_v53  ;;  %v2866_v34 = vpack.c.bf16 %v3763_v33, %v3762_v25 }
 0x1f6   :  { %v2785_v46 = vpack.c.bf16 %v1387_v28, %v1380_v22  ;;  %v1393_v55 = vsub.f32 %v3510_v54, %v1392_v35  ;;  %v1442_v22 = vsub.f32 %v3529_v15, %v3752_v12  ;;  %v3765_v54 = vand.u32 4294901760, %v3529_v15 }
 0x1f7   :  { %v1436_v28 = vand.u32 4294901760, %v1435_v20 }
 0x1f8   :  { %2768 = vmatpush3.bf16.msra.mxu0 %v3495_v47  ;;  %v1394_v6 = vand.u32 4294901760, %v1393_v55  ;;  %v1443_v55 = vand.u32 4294901760, %v1442_v22  ;;  %v2869_v59 = vpack.c.bf16 %v3765_v54, %v3764_v52 }
 0x1f9   :  { %2769 = vmatprep.subr.bf16.mxu0 %v3065_v0 }
 0x1fa   :  { %v2788_v57 = vpack.c.bf16 %v1401_v26, %v1394_v6  ;;  %v2797_v56 = vpack.c.bf16 %v1443_v55, %v1436_v28  ;;  %v2800_v6 = vpack.c.bf16 %v3370_v60, %v3368_v50  ;;  %v2803_v26 = vpack.c.bf16 %v3374_v51, %v3372_v41 }
 0x1fb   :  { %v2854_v50 = vpack.c.bf16 %v1371_v31, %v1364_v19  ;;  %v2857_v60 = vpack.c.bf16 %v1385_v58, %v1378_v10  ;;  %v2860_v41 = vpack.c.bf16 %v1399_v39, %v1392_v35  ;;  %v2863_v51 = vpack.c.bf16 %v1413_v24, %v1406_v23 }
 0x1fc   :  { %2771 = vmatpush3.bf16.msra.mxu0 %v3499_v30 }
 0x1fd   :  { %2772 = vmatprep.subr.bf16.mxu0 %v3065_v0 }
 0x200   :  { %2774 = vmatpush3.bf16.msra.mxu0 %v3525_v44 }
 0x201   :  { %2775 = vmatprep.subr.bf16.mxu0 %v3065_v0 }
 0x2c6   :  { %v1214_v48 = vpop.f32.mrb[2].mxu1 }
 0x2c7   :  { %v2897_v20 = vadd.f32 %v1903_v43, %v1214_v48  ;;  %v2378_v22 = vpop.f32.mrb[3].mxu1 }
 0x2c9   :  { %2939 = vtanh.f32 %v2897_v20 }
 0x2d3   :  { %v2940_v28 = vpop.eup %2939 }
 0x2d4   :  { %v3618_v55 = vand.u32 4294901760, %v2940_v28 }
 0x2d6   :  { %v1324_v12 = vsub.f32 %v2940_v28, %v3618_v55 }
 0x2d8   :  { %v1325_v53 = vand.u32 4294901760, %v1324_v12 }
 0x2da   :  { %v1326_v3 = vsub.f32 %v1324_v12, %v1325_v53 }
 0x2dc   :  { %v1327_v2 = vand.u32 4294901760, %v1326_v3 }
 0x2de   :  { %2412 = vmatmul.mubr.f32.vlgmr.msra.gmra.mrb[2].mxu0 %v1327_v2 }
 0x2df   :  { %2777 = vmatpush3.bf16.msra.mxu0 %v3547_v16  ;;  %2446 = vmatprep.mubr.msk.f32.mxu0 %vm3066_vm0, %v3067_v1  ;;  %v2848_v16 = vpack.c.bf16 %v1343_v32, %v1336_v14 }
 0x2e0   :  { %2778 = vmatprep.subr.bf16.mxu0 %v3065_v0 }
 0x2e3   :  { %2780 = vmatpush3.bf16.msra.mxu0 %v3551_v36  ;;  %v2851_v36 = vpack.c.bf16 %v1357_v38, %v1350_v37 }
 0x2e4   :  { %2781 = vmatprep.subr.bf16.mxu0 %v3065_v0 }
 0x2e7   :  { %2783 = vmatpush3.bf16.msra.mxu0 %v2782_v21 }
 0x2e8   :  { %2784 = vmatprep.subr.bf16.mxu0 %v3065_v0 }
 0x2eb   :  { %2786 = vmatpush3.bf16.msra.mxu0 %v2785_v46 }
 0x2ec   :  { %2787 = vmatprep.subr.bf16.mxu0 %v3065_v0 }
 0x2ef   :  { %2789 = vmatpush3.bf16.msra.mxu0 %v2788_v57 }
 0x2f0   :  { %2790 = vmatprep.subr.bf16.mxu0 %v3065_v0 }
 0x2f3   :  { %2792 = vmatpush3.bf16.msra.mxu0 %v2791_v4 }
 0x2f4   :  { %2793 = vmatprep.subr.bf16.mxu0 %v3065_v0 }
 0x2f7   :  { %2795 = vmatpush3.bf16.msra.mxu0 %v2794_v13 }
 0x2f8   :  { %2796 = vmatprep.subr.bf16.mxu0 %v3065_v0 }
 0x2fb   :  { %2798 = vmatpush3.bf16.msra.mxu0 %v2797_v56 }
 0x2fc   :  { %2799 = vmatprep.subr.bf16.mxu0 %v3065_v0 }
 0x2fe   :  { %2447 = vmatmul.mubr.f32.vlgmr.msra.gmra.mrb[2].mxu0 %v3618_v55 }
 0x2ff   :  { %2801 = vmatpush3.bf16.msra.mxu0 %v2800_v6  ;;  %2481 = vmatprep.mubr.msk.f32.mxu0 %vm3066_vm0, %v3067_v1 }
 0x300   :  { %2802 = vmatprep.subr.bf16.mxu0 %v3065_v0 }
 0x303   :  { %2804 = vmatpush3.bf16.msra.mxu0 %v2803_v26 }
 0x304   :  { %2805 = vmatprep.subr.bf16.mxu0 %v3065_v0 }
 0x307   :  { %2807 = vmatpush3.bf16.msra.mxu0 %v2806_v5 }
 0x308   :  { %2808 = vmatprep.subr.bf16.mxu0 %v3065_v0 }
 0x30b   :  { %2810 = vmatpush3.bf16.msra.mxu0 %v2809_v17 }
 0x30c   :  { %2811 = vmatprep.subr.bf16.mxu0 %v3065_v0 }
 0x30f   :  { %2813 = vmatpush3.bf16.msra.mxu0 %v2812_v18 }
 0x310   :  { %2814 = vmatprep.subr.bf16.mxu0 %v3065_v0 }
 0x313   :  { %2816 = vmatpush3.bf16.msra.mxu0 %v2815_v63 }
 0x314   :  { %2817 = vmatprep.subr.bf16.mxu0 %v3065_v0 }
 0x317   :  { %2819 = vmatpush3.bf16.msra.mxu0 %v2818_v7 }
 0x318   :  { %2820 = vmatprep.subr.bf16.mxu0 %v3065_v0 }
 0x31b   :  { %2822 = vmatpush3.bf16.msra.mxu0 %v2821_v8 }
 0x31c   :  { %2823 = vmatprep.subr.bf16.mxu0 %v3065_v0 }
 0x31e   :  { %2482 = vmatmul.mubr.f32.vlgmr.msra.gmra.mrb[2].mxu0 %v1324_v12 }
 0x31f   :  { %2825 = vmatpush3.bf16.msra.mxu0 %v3366_v45  ;;  %2516 = vmatprep.mubr.msk.f32.mxu0 %vm3066_vm0, %v3067_v1 }
 0x320   :  { %2826 = vmatprep.subr.bf16.mxu0 %v3065_v0 }
 0x323   :  { %2828 = vmatpush3.bf16.msra.mxu0 %v3377_v61 }
 0x324   :  { %2829 = vmatprep.subr.bf16.mxu0 %v3065_v0 }
 0x327   :  { %2831 = vmatpush3.bf16.msra.mxu0 %v3483_v9 }
 0x328   :  { %2832 = vmatprep.subr.bf16.mxu0 %v3065_v0 }
 0x32b   :  { %2834 = vmatpush3.bf16.msra.mxu0 %v3487_v11 }
 0x32c   :  { %2835 = vmatprep.subr.bf16.mxu0 %v3065_v0 }
 0x32f   :  { %2837 = vmatpush3.bf16.msra.mxu0 %v3491_v27 }
 0x330   :  { %2838 = vmatprep.subr.bf16.mxu0 %v3065_v0 }
 0x333   :  { %2840 = vmatpush3.bf16.msra.mxu0 %v3495_v47 }
 0x334   :  { %2841 = vmatprep.subr.bf16.mxu0 %v3065_v0 }
 0x337   :  { %2843 = vmatpush3.bf16.msra.mxu0 %v3499_v30 }
 0x338   :  { %2844 = vmatprep.subr.bf16.mxu0 %v3065_v0 }
 0x33b   :  { %2846 = vmatpush3.bf16.msra.mxu0 %v3525_v44 }
 0x33c   :  { %2847 = vmatprep.subr.bf16.mxu0 %v3065_v0 }
 0x33e   :  { %2517 = vmatmul.mubr.f32.vlgmr.msra.gmra.mrb[2].mxu0 %v1325_v53 }
 0x33f   :  { %2849 = vmatpush3.bf16.msra.mxu0 %v2848_v16  ;;  %2551 = vmatprep.mubr.msk.f32.mxu0 %vm3066_vm0, %v3067_v1 }
 0x340   :  { %2850 = vmatprep.subr.bf16.mxu0 %v3065_v0 }
 0x343   :  { %2852 = vmatpush3.bf16.msra.mxu0 %v2851_v36 }
 0x344   :  { %2853 = vmatprep.subr.bf16.mxu0 %v3065_v0 }
 0x347   :  { %2855 = vmatpush3.bf16.msra.mxu0 %v2854_v50 }
 0x348   :  { %2856 = vmatprep.subr.bf16.mxu0 %v3065_v0 }
 0x34b   :  { %2858 = vmatpush3.bf16.msra.mxu0 %v2857_v60 }
 0x34c   :  { %2859 = vmatprep.subr.bf16.mxu0 %v3065_v0 }
 0x34f   :  { %2861 = vmatpush3.bf16.msra.mxu0 %v2860_v41 }
 0x350   :  { %2862 = vmatprep.subr.bf16.mxu0 %v3065_v0 }
 0x353   :  { %2864 = vmatpush3.bf16.msra.mxu0 %v2863_v51 }
 0x354   :  { %2865 = vmatprep.subr.bf16.mxu0 %v3065_v0 }
 0x357   :  { %2867 = vmatpush3.bf16.msra.mxu0 %v2866_v34 }
 0x358   :  { %2868 = vmatprep.subr.bf16.mxu0 %v3065_v0 }
 0x35b   :  { %2870 = vmatpush3.bf16.msra.mxu0 %v2869_v59 }
 0x35c   :  { %2871 = vmatprep.subr.bf16.mxu0 %v3065_v0 }
 0x35e   :  { %2552 = vmatmul.mubr.f32.vlgmr.msra.gmra.mrb[2].mxu0 %v3618_v55 }
 0x35f   :  { %2873 = vmatpush3.bf16.msra.mxu0 %v3366_v45  ;;  %2586 = vmatprep.mubr.msk.f32.mxu0 %vm3066_vm0, %v3067_v1  ;;  %v1904_v1 = vld [vmem:[%s3744_s6] ss:$0 sm:$0xff] }
 0x360   :  { %2874 = vmatprep.subr.bf16.mxu0 %v3065_v0 }
 0x363   :  { %2876 = vmatpush3.bf16.msra.mxu0 %v3377_v61 }
 0x364   :  { %2877 = vmatprep.subr.bf16.mxu0 %v3065_v0 }
 0x367   :  { %2879 = vmatpush3.bf16.msra.mxu0 %v3483_v9 }
 0x368   :  { %2880 = vmatprep.subr.bf16.mxu0 %v3065_v0 }
 0x36b   :  { %2882 = vmatpush3.bf16.msra.mxu0 %v3487_v11 }
 0x36c   :  { %2883 = vmatprep.subr.bf16.mxu0 %v3065_v0 }
 0x36f   :  { %2885 = vmatpush3.bf16.msra.mxu0 %v3491_v27 }
 0x370   :  { %2886 = vmatprep.subr.bf16.mxu0 %v3065_v0 }
 0x373   :  { %2888 = vmatpush3.bf16.msra.mxu0 %v3495_v47 }
 0x374   :  { %2889 = vmatprep.subr.bf16.mxu0 %v3065_v0 }
 0x377   :  { %2891 = vmatpush3.bf16.msra.mxu0 %v3499_v30 }
 0x378   :  { %2892 = vmatprep.subr.bf16.mxu0 %v3065_v0 }
 0x37b   :  { %2894 = vmatpush3.bf16.msra.mxu0 %v3525_v44 }
 0x37e   :  { %2587 = vmatmul.mubr.f32.vlgmr.msra.gmra.mrb[2].mxu0 %v3618_v55 }
 0x451   :  { %v1879_v45 = vpop.f32.mrb[2].mxu0 }
 0x452   :  { %v2898_v61 = vadd.f32 %v1904_v1, %v1879_v45  ;;  %v2588_v9 = vpop.f32.mrb[3].mxu0 }
 0x454   :  { %1884 = vst.msk [vmem:[#allocation10] sm:$0xff] %vm1883_vm2, %v2898_v61 }
 0x455   :  { %3040 = shalt.err (!%p3037_p8)
}
 0x456   :  { %s3041_s9 = scalar_lea.hbm %s3745_s7, 128 }
 0x457   :  { %p3042_p9 = scmp.ne.s32.totalorder %s3745_s7, %s3041_s9  ;;  %p3045_p10 = scmp.lt.u32.totalorder %s3041_s9, %s3745_s7 }
 0x459   :  { %p3047_p11 = pnand %p3045_p10, %p3042_p9 }
 0x45b   :  { %3050 = shalt.err (!%p3047_p11)
}
 0x45c   :  { %1894 = dma.vmem_to_hbm [thread:$0]  %s1892_s28, 128, %s3745_s7, [#allocation4]  }
 0x45d   :  { %3057 = dma.done.wait [#allocation4], 128  }
 0x45e   :  { %3058 = vsyncadd [#allocation4], 4294967168 }
 0x45f   :  { %1898 = vsyncpa [#allocation3], 1 }
 0x460   :  { %1899 = vsyncpa [#allocation6], 1 }
 0x461   :  { %1900 = vsyncpa [#allocation9], 1 }
 0x462   :  { %1901 = vsyncpa [#allocation4], 1 }

</bundles_post_ra>
